<compile_context>
chip_gen: v7x
topology: tpu7x:2x2x1
jax: 0.10.0
libtpu: 0.0.40
codegen_flags: <defaults>
</compile_context>

<pallas_src>
import jax
import jax.numpy as jnp
from jax import lax
from jax.experimental import pallas as pl
from jax.experimental.pallas import tpu as pltpu


def _round_up(x, m):
    return (x + m - 1) // m * m


def _prep_conv_params(w_oihw, bias, slot, kp, m_pad):
    """PyTorch Conv2d weight (Cout, Cin, 3, 3) + bias (Cout,) ->
       K-packed weight (m_pad, kp) bf16 whose column index is k*slot + ci with
       k = ky*3 + kx, and bias (m_pad, 1) f32 (broadcasts along lanes)."""
    cout, cin = w_oihw.shape[0], w_oihw.shape[1]
    w = jnp.transpose(w_oihw, (0, 2, 3, 1)).reshape(cout, 9, cin)   # [co, k, ci]
    w = jnp.pad(w, ((0, m_pad - cout), (0, 0), (0, slot - cin)))
    w = w.reshape(m_pad, 9 * slot)
    w = jnp.pad(w, ((0, 0), (0, kp - 9 * slot))).astype(jnp.bfloat16)
    b = jnp.pad(bias, (0, m_pad - cout)).astype(jnp.float32).reshape(m_pad, 1)
    return w, b


def _make_kernel(H, W, Cout, slot, kp, pad, pbw):
    HW = H * W
    kr = 9 * slot  # real contraction rows

    def fill_col(pbuf_ref, col_ref, keep_left, keep_right):
        # col slot k = rows [k*slot, (k+1)*slot): activation shifted by
        # (ky-1)*W + (kx-1) along the flat lane axis.  Vertical out-of-range
        # reads land in pbuf's zeroed halos; horizontal ones are masked.
        for ky in range(3):
            for kx in range(3):
                k = ky * 3 + kx
                start = pad + (ky - 1) * W + (kx - 1)
                tap = pbuf_ref[:, start:start + HW]            # (slot, HW) bf16
                if kx == 0:
                    tap = jnp.where(keep_left, tap, jnp.zeros_like(tap))
                elif kx == 2:
                    tap = jnp.where(keep_right, tap, jnp.zeros_like(tap))
                col_ref[k * slot:(k + 1) * slot, :] = tap

    def kernel(x_ref, xcol_ref, w1_ref, b1_ref, w2_ref, b2_ref, o_ref,
               pbuf_ref, col_ref):
        # Horizontal-border masks (hoisted; broadcast once, reused by 6 taps).
        xcol = xcol_ref[...]                                   # (1, HW) int32
        keep_left = jnp.broadcast_to(xcol > 0, (slot, HW))     # tap reads x-1
        keep_right = jnp.broadcast_to(xcol < (W - 1), (slot, HW))  # reads x+1

        # Border-only zero fills (re-done every step -> "parallel"-safe).
        zhalo = jnp.zeros((slot, pad), jnp.bfloat16)
        pbuf_ref[:, 0:pad] = zhalo
        pbuf_ref[:, pad + HW:pbw] = zhalo
        if kp > kr:
            col_ref[kr:kp, :] = jnp.zeros((kp - kr, HW), jnp.bfloat16)

        # ---- conv1: fill row buffer, K-packed im2col, one MXU matmul ----
        pbuf_ref[:, pad:pad + HW] = x_ref[0].astype(jnp.bfloat16)
        fill_col(pbuf_ref, col_ref, keep_left, keep_right)
        y1 = jnp.dot(w1_ref[...], col_ref[...],
                     preferred_element_type=jnp.float32)       # (slot, HW) f32
        y1 = jnp.maximum(y1 + b1_ref[...], 0.0)

        # ---- conv2: intermediate stays on-chip (VMEM row buffer reuse) ----
        pbuf_ref[:, pad:pad + HW] = y1.astype(jnp.bfloat16)
        fill_col(pbuf_ref, col_ref, keep_left, keep_right)
        y2 = jnp.dot(w2_ref[...], col_ref[...],
                     preferred_element_type=jnp.float32)       # (m2, HW) f32
        y2 = jnp.maximum(y2 + b2_ref[...], 0.0)

        # Output already in NCHW-flat layout: lane-dense (HW lanes), no transpose.
        o_ref[0] = y2[0:Cout, :]

    return kernel


@jax.jit
def double_conv_forward(x_nchw, w1, b1, w2, b2):
    """Double_Conv forward: (Conv3x3 pad=1 + ReLU) x 2.

    x_nchw: (N, Cin, H, W) f32; w1: (Cmid, Cin, 3, 3); w2: (Cout, Cmid, 3, 3).
    Returns (N, Cout, H, W) f32.
    """
    N, Cin, H, W = x_nchw.shape
    Cmid, Cout = w1.shape[0], w2.shape[0]
    HW = H * W

    slot = max(_round_up(Cin, 8), _round_up(Cmid, 8))   # channel slot (sublanes)
    kp = _round_up(9 * slot, 128)                       # packed contraction dim
    m2 = _round_up(Cout, 8)
    pad = _round_up(W + 1, 128)                         # flat halo width (lanes)
    pbw = 2 * pad + HW                                  # row-buffer lane width

    # Host-side prep (tiny, one-time): K-packed bf16 weights, column-index map,
    # channel-pad the input to the 8-row slot so the kernel does whole-row stores.
    w1m, b1m = _prep_conv_params(w1, b1, slot, kp, slot)
    w2m, b2m = _prep_conv_params(w2, b2, slot, kp, m2)
    xcol = (jnp.arange(HW, dtype=jnp.int32) % W).reshape(1, HW)
    x_flat = jnp.pad(x_nchw.reshape(N, Cin, HW), ((0, 0), (0, slot - Cin), (0, 0)))

    kernel = _make_kernel(H, W, Cout, slot, kp, pad, pbw)

    out = pl.pallas_call(
        kernel,
        out_shape=jax.ShapeDtypeStruct((N, Cout, HW), jnp.float32),
        grid_spec=pltpu.PrefetchScalarGridSpec(
            num_scalar_prefetch=0,
            grid=(N,),
            in_specs=[
                pl.BlockSpec((1, slot, HW), lambda n: (n, 0, 0)),  # input image
                pl.BlockSpec((1, HW), lambda n: (0, 0)),           # x coords
                pl.BlockSpec((slot, kp), lambda n: (0, 0)),        # w1 (K-packed)
                pl.BlockSpec((slot, 1), lambda n: (0, 0)),         # b1
                pl.BlockSpec((m2, kp), lambda n: (0, 0)),          # w2 (K-packed)
                pl.BlockSpec((m2, 1), lambda n: (0, 0)),           # b2
            ],
            out_specs=pl.BlockSpec((1, Cout, HW), lambda n: (n, 0, 0)),
            scratch_shapes=[
                pltpu.VMEM((slot, pbw), jnp.bfloat16),   # flat padded activation
                pltpu.VMEM((kp, HW), jnp.bfloat16),      # K-packed im2col (shared)
            ],
        ),
        compiler_params=pltpu.CompilerParams(
            dimension_semantics=("parallel",),
        ),
    )(x_flat, xcol, w1m, b1m, w2m, b2m)

    return out.reshape(N, Cout, H, W)


def _reference_double_conv(x_nchw, w1, b1, w2, b2):
    """Pure-JAX f32 reference (lax.conv, NCHW) matching the PyTorch module."""
    def conv(x, w, b):
        y = lax.conv_general_dilated(
            x, w, window_strides=(1, 1), padding=((1, 1), (1, 1)),
            dimension_numbers=("NCHW", "OIHW", "NCHW"))
        return jnp.maximum(y + b[None, :, None, None], 0.0)
    return conv(conv(x_nchw, w1, b1), w2, b2)


if __name__ == "__main__":
    key = jax.random.PRNGKey(0)
    N, Cin, H, W = 2, 4, 16, 16
    Cmid = Cout = 8   # Double_Conv(input_channels=4, output_channels=8)

    k_x, k_w1, k_b1, k_w2, k_b2 = jax.random.split(key, 5)
    x = jax.random.normal(k_x, (N, Cin, H, W), dtype=jnp.float32)
    w1 = 0.1 * jax.random.normal(k_w1, (Cmid, Cin, 3, 3), dtype=jnp.float32)
    b1 = 0.1 * jax.random.normal(k_b1, (Cmid,), dtype=jnp.float32)
    w2 = 0.1 * jax.random.normal(k_w2, (Cout, Cmid, 3, 3), dtype=jnp.float32)
    b2 = 0.1 * jax.random.normal(k_b2, (Cout,), dtype=jnp.float32)

    out = jax.block_until_ready(double_conv_forward(x, w1, b1, w2, b2))
    ref = _reference_double_conv(x, w1, b1, w2, b2)

    assert out.shape == (N, Cout, H, W)
    # Matmul operands are bf16 on the MXU (per perf review) -> loosened tolerance
    # relative to the pure-f32 reference.
    assert jnp.allclose(out, ref, atol=2e-2, rtol=2e-2), (
        "mismatch vs reference, max abs err = "
        f"{float(jnp.max(jnp.abs(out - ref)))}")
    print("KERNEL_OK")
</pallas_src>

<mosaic_0001>
module attributes {stable_mosaic.version = 11 : i64} {
  func.func @kernel(%arg0: i32, %arg1: memref<1x8x256xf32, #tpu.memory_space<vmem>>, %arg2: memref<1x256xi32, #tpu.memory_space<vmem>>, %arg3: memref<8x128xbf16, #tpu.memory_space<vmem>>, %arg4: memref<8x1xf32, #tpu.memory_space<vmem>>, %arg5: memref<8x128xbf16, #tpu.memory_space<vmem>>, %arg6: memref<8x1xf32, #tpu.memory_space<vmem>>, %arg7: memref<1x8x256xf32, #tpu.memory_space<vmem>>, %arg8: memref<8x512xbf16, #tpu.memory_space<vmem>>, %arg9: memref<128x256xbf16, #tpu.memory_space<vmem>>) attributes {dimension_semantics = [#tpu.dimension_semantics<parallel>], iteration_bounds = array<i64: 2>, scalar_prefetch = 0 : i64, scratch_operands = 2 : i64, tpu.core_type = #tpu.core_type<tc>, window_params = [{transform_indices = @transform_0, window_bounds = array<i64: 1, 8, 256>}, {pipeline_mode = #tpu.pipeline_mode<synchronous>, transform_indices = @transform_1, window_bounds = array<i64: 1, 256>}, {pipeline_mode = #tpu.pipeline_mode<synchronous>, transform_indices = @transform_2, window_bounds = array<i64: 8, 128>}, {pipeline_mode = #tpu.pipeline_mode<synchronous>, transform_indices = @transform_3, window_bounds = array<i64: 8, 1>}, {pipeline_mode = #tpu.pipeline_mode<synchronous>, transform_indices = @transform_4, window_bounds = array<i64: 8, 128>}, {pipeline_mode = #tpu.pipeline_mode<synchronous>, transform_indices = @transform_5, window_bounds = array<i64: 8, 1>}, {transform_indices = @transform_6, window_bounds = array<i64: 1, 8, 256>}]} {
    %c0 = arith.constant 0 : index
    %c0_0 = arith.constant 0 : index
    %0 = vector.load %arg2[%c0, %c0_0] : memref<1x256xi32, #tpu.memory_space<vmem>>, vector<1x256xi32>
    %c0_i32 = arith.constant 0 : i32
    %1 = vector.broadcast %c0_i32 : i32 to vector<1x256xi32>
    %2 = arith.cmpi sgt, %0, %1 : vector<1x256xi32>
    %3 = vector.shape_cast %2 : vector<1x256xi1> to vector<1x256xi1>
    %4 = vector.broadcast %3 : vector<1x256xi1> to vector<8x256xi1>
    %c15_i32 = arith.constant 15 : i32
    %5 = vector.broadcast %c15_i32 : i32 to vector<1x256xi32>
    %6 = arith.cmpi slt, %0, %5 : vector<1x256xi32>
    %7 = vector.shape_cast %6 : vector<1x256xi1> to vector<1x256xi1>
    %8 = vector.broadcast %7 : vector<1x256xi1> to vector<8x256xi1>
    %cst = arith.constant 0.000000e+00 : bf16
    %9 = vector.broadcast %cst : bf16 to vector<8x128xbf16>
    %c0_1 = arith.constant 0 : index
    %c0_2 = arith.constant 0 : index
    %10 = vector.load %arg8[%c0_1, %c0_2] : memref<8x512xbf16, #tpu.memory_space<vmem>>, vector<8x128xbf16>
    tpu.vector_store %arg8[%c0_1, %c0_2], %9 {strides = array<i32>} : memref<8x512xbf16, #tpu.memory_space<vmem>>, vector<8x128xbf16>,
    %c0_3 = arith.constant 0 : index
    %c384 = arith.constant 384 : index
    %11 = vector.load %arg8[%c0_3, %c384] : memref<8x512xbf16, #tpu.memory_space<vmem>>, vector<8x128xbf16>
    tpu.vector_store %arg8[%c0_3, %c384], %9 {strides = array<i32>} : memref<8x512xbf16, #tpu.memory_space<vmem>>, vector<8x128xbf16>,
    %cst_4 = arith.constant 0.000000e+00 : bf16
    %12 = vector.broadcast %cst_4 : bf16 to vector<56x256xbf16>
    %c72 = arith.constant 72 : index
    %c0_5 = arith.constant 0 : index
    %13 = vector.load %arg9[%c72, %c0_5] : memref<128x256xbf16, #tpu.memory_space<vmem>>, vector<56x256xbf16>
    tpu.vector_store %arg9[%c72, %c0_5], %12 {strides = array<i32>} : memref<128x256xbf16, #tpu.memory_space<vmem>>, vector<56x256xbf16>,
    %c0_6 = arith.constant 0 : index
    %c0_7 = arith.constant 0 : index
    %c0_8 = arith.constant 0 : index
    %14 = vector.load %arg1[%c0_6, %c0_7, %c0_8] : memref<1x8x256xf32, #tpu.memory_space<vmem>>, vector<1x8x256xf32>
    %15 = vector.shape_cast %14 : vector<1x8x256xf32> to vector<8x256xf32>
    %16 = arith.truncf %15 : vector<8x256xf32> to vector<8x256xbf16>
    %c0_9 = arith.constant 0 : index
    %c128 = arith.constant 128 : index
    %17 = vector.load %arg8[%c0_9, %c128] : memref<8x512xbf16, #tpu.memory_space<vmem>>, vector<8x256xbf16>
    tpu.vector_store %arg8[%c0_9, %c128], %16 {strides = array<i32>} : memref<8x512xbf16, #tpu.memory_space<vmem>>, vector<8x256xbf16>,
    %c0_10 = arith.constant 0 : index
    %c111 = arith.constant 111 : index
    %18 = vector.load %arg8[%c0_10, %c111] : memref<8x512xbf16, #tpu.memory_space<vmem>>, vector<8x256xbf16>
    %cst_11 = arith.constant 0.000000e+00 : bf16
    %19 = vector.broadcast %cst_11 : bf16 to vector<8x256xbf16>
    %20 = arith.select %4, %18, %19 : vector<8x256xi1>, vector<8x256xbf16>
    %c0_12 = arith.constant 0 : index
    %c0_13 = arith.constant 0 : index
    %21 = vector.load %arg9[%c0_12, %c0_13] : memref<128x256xbf16, #tpu.memory_space<vmem>>, vector<8x256xbf16>
    tpu.vector_store %arg9[%c0_12, %c0_13], %20 {strides = array<i32>} : memref<128x256xbf16, #tpu.memory_space<vmem>>, vector<8x256xbf16>,
    %c0_14 = arith.constant 0 : index
    %c112 = arith.constant 112 : index
    %22 = vector.load %arg8[%c0_14, %c112] : memref<8x512xbf16, #tpu.memory_space<vmem>>, vector<8x256xbf16>
    %c8 = arith.constant 8 : index
    %c0_15 = arith.constant 0 : index
    %23 = vector.load %arg9[%c8, %c0_15] : memref<128x256xbf16, #tpu.memory_space<vmem>>, vector<8x256xbf16>
    tpu.vector_store %arg9[%c8, %c0_15], %22 {strides = array<i32>} : memref<128x256xbf16, #tpu.memory_space<vmem>>, vector<8x256xbf16>,
    %c0_16 = arith.constant 0 : index
    %c113 = arith.constant 113 : index
    %24 = vector.load %arg8[%c0_16, %c113] : memref<8x512xbf16, #tpu.memory_space<vmem>>, vector<8x256xbf16>
    %cst_17 = arith.constant 0.000000e+00 : bf16
    %25 = vector.broadcast %cst_17 : bf16 to vector<8x256xbf16>
    %26 = arith.select %8, %24, %25 : vector<8x256xi1>, vector<8x256xbf16>
    %c16 = arith.constant 16 : index
    %c0_18 = arith.constant 0 : index
    %27 = vector.load %arg9[%c16, %c0_18] : memref<128x256xbf16, #tpu.memory_space<vmem>>, vector<8x256xbf16>
    tpu.vector_store %arg9[%c16, %c0_18], %26 {strides = array<i32>} : memref<128x256xbf16, #tpu.memory_space<vmem>>, vector<8x256xbf16>,
    %c0_19 = arith.constant 0 : index
    %c127 = arith.constant 127 : index
    %28 = vector.load %arg8[%c0_19, %c127] : memref<8x512xbf16, #tpu.memory_space<vmem>>, vector<8x256xbf16>
    %cst_20 = arith.constant 0.000000e+00 : bf16
    %29 = vector.broadcast %cst_20 : bf16 to vector<8x256xbf16>
    %30 = arith.select %4, %28, %29 : vector<8x256xi1>, vector<8x256xbf16>
    %c24 = arith.constant 24 : index
    %c0_21 = arith.constant 0 : index
    %31 = vector.load %arg9[%c24, %c0_21] : memref<128x256xbf16, #tpu.memory_space<vmem>>, vector<8x256xbf16>
    tpu.vector_store %arg9[%c24, %c0_21], %30 {strides = array<i32>} : memref<128x256xbf16, #tpu.memory_space<vmem>>, vector<8x256xbf16>,
    %c0_22 = arith.constant 0 : index
    %c128_23 = arith.constant 128 : index
    %32 = vector.load %arg8[%c0_22, %c128_23] : memref<8x512xbf16, #tpu.memory_space<vmem>>, vector<8x256xbf16>
    %c32 = arith.constant 32 : index
    %c0_24 = arith.constant 0 : index
    %33 = vector.load %arg9[%c32, %c0_24] : memref<128x256xbf16, #tpu.memory_space<vmem>>, vector<8x256xbf16>
    tpu.vector_store %arg9[%c32, %c0_24], %32 {strides = array<i32>} : memref<128x256xbf16, #tpu.memory_space<vmem>>, vector<8x256xbf16>,
    %c0_25 = arith.constant 0 : index
    %c129 = arith.constant 129 : index
    %34 = vector.load %arg8[%c0_25, %c129] : memref<8x512xbf16, #tpu.memory_space<vmem>>, vector<8x256xbf16>
    %cst_26 = arith.constant 0.000000e+00 : bf16
    %35 = vector.broadcast %cst_26 : bf16 to vector<8x256xbf16>
    %36 = arith.select %8, %34, %35 : vector<8x256xi1>, vector<8x256xbf16>
    %c40 = arith.constant 40 : index
    %c0_27 = arith.constant 0 : index
    %37 = vector.load %arg9[%c40, %c0_27] : memref<128x256xbf16, #tpu.memory_space<vmem>>, vector<8x256xbf16>
    tpu.vector_store %arg9[%c40, %c0_27], %36 {strides = array<i32>} : memref<128x256xbf16, #tpu.memory_space<vmem>>, vector<8x256xbf16>,
    %c0_28 = arith.constant 0 : index
    %c143 = arith.constant 143 : index
    %38 = vector.load %arg8[%c0_28, %c143] : memref<8x512xbf16, #tpu.memory_space<vmem>>, vector<8x256xbf16>
    %cst_29 = arith.constant 0.000000e+00 : bf16
    %39 = vector.broadcast %cst_29 : bf16 to vector<8x256xbf16>
    %40 = arith.select %4, %38, %39 : vector<8x256xi1>, vector<8x256xbf16>
    %c48 = arith.constant 48 : index
    %c0_30 = arith.constant 0 : index
    %41 = vector.load %arg9[%c48, %c0_30] : memref<128x256xbf16, #tpu.memory_space<vmem>>, vector<8x256xbf16>
    tpu.vector_store %arg9[%c48, %c0_30], %40 {strides = array<i32>} : memref<128x256xbf16, #tpu.memory_space<vmem>>, vector<8x256xbf16>,
    %c0_31 = arith.constant 0 : index
    %c144 = arith.constant 144 : index
    %42 = vector.load %arg8[%c0_31, %c144] : memref<8x512xbf16, #tpu.memory_space<vmem>>, vector<8x256xbf16>
    %c56 = arith.constant 56 : index
    %c0_32 = arith.constant 0 : index
    %43 = vector.load %arg9[%c56, %c0_32] : memref<128x256xbf16, #tpu.memory_space<vmem>>, vector<8x256xbf16>
    tpu.vector_store %arg9[%c56, %c0_32], %42 {strides = array<i32>} : memref<128x256xbf16, #tpu.memory_space<vmem>>, vector<8x256xbf16>,
    %c0_33 = arith.constant 0 : index
    %c145 = arith.constant 145 : index
    %44 = vector.load %arg8[%c0_33, %c145] : memref<8x512xbf16, #tpu.memory_space<vmem>>, vector<8x256xbf16>
    %cst_34 = arith.constant 0.000000e+00 : bf16
    %45 = vector.broadcast %cst_34 : bf16 to vector<8x256xbf16>
    %46 = arith.select %8, %44, %45 : vector<8x256xi1>, vector<8x256xbf16>
    %c64 = arith.constant 64 : index
    %c0_35 = arith.constant 0 : index
    %47 = vector.load %arg9[%c64, %c0_35] : memref<128x256xbf16, #tpu.memory_space<vmem>>, vector<8x256xbf16>
    tpu.vector_store %arg9[%c64, %c0_35], %46 {strides = array<i32>} : memref<128x256xbf16, #tpu.memory_space<vmem>>, vector<8x256xbf16>,
    %c0_36 = arith.constant 0 : index
    %c0_37 = arith.constant 0 : index
    %48 = vector.load %arg3[%c0_36, %c0_37] : memref<8x128xbf16, #tpu.memory_space<vmem>>, vector<8x128xbf16>
    %c0_38 = arith.constant 0 : index
    %c0_39 = arith.constant 0 : index
    %49 = vector.load %arg9[%c0_38, %c0_39] : memref<128x256xbf16, #tpu.memory_space<vmem>>, vector<128x256xbf16>
    %cst_40 = arith.constant dense<0.000000e+00> : vector<8x256xf32>
    %50 = tpu.matmul %48, %49, %cst_40 {dimension_numbers = #tpu.dot_dimension_numbers<[1], [0], [0], [1], [0, 0, 1, 1], [], []>} : vector<8x128xbf16>, vector<128x256xbf16>, vector<8x256xf32> -> vector<8x256xf32>
    %c0_41 = arith.constant 0 : index
    %c0_42 = arith.constant 0 : index
    %51 = vector.load %arg4[%c0_41, %c0_42] : memref<8x1xf32, #tpu.memory_space<vmem>>, vector<8x1xf32>
    %52 = vector.broadcast %51 : vector<8x1xf32> to vector<8x256xf32>
    %53 = arith.addf %50, %52 : vector<8x256xf32>
    %cst_43 = arith.constant 0.000000e+00 : f32
    %54 = vector.broadcast %cst_43 : f32 to vector<8x256xf32>
    %55 = arith.maximumf %53, %54 : vector<8x256xf32>
    %56 = arith.truncf %55 : vector<8x256xf32> to vector<8x256xbf16>
    %c0_44 = arith.constant 0 : index
    %c128_45 = arith.constant 128 : index
    %57 = vector.load %arg8[%c0_44, %c128_45] : memref<8x512xbf16, #tpu.memory_space<vmem>>, vector<8x256xbf16>
    tpu.vector_store %arg8[%c0_44, %c128_45], %56 {strides = array<i32>} : memref<8x512xbf16, #tpu.memory_space<vmem>>, vector<8x256xbf16>,
    %c0_46 = arith.constant 0 : index
    %c111_47 = arith.constant 111 : index
    %58 = vector.load %arg8[%c0_46, %c111_47] : memref<8x512xbf16, #tpu.memory_space<vmem>>, vector<8x256xbf16>
    %cst_48 = arith.constant 0.000000e+00 : bf16
    %59 = vector.broadcast %cst_48 : bf16 to vector<8x256xbf16>
    %60 = arith.select %4, %58, %59 : vector<8x256xi1>, vector<8x256xbf16>
    %c0_49 = arith.constant 0 : index
    %c0_50 = arith.constant 0 : index
    %61 = vector.load %arg9[%c0_49, %c0_50] : memref<128x256xbf16, #tpu.memory_space<vmem>>, vector<8x256xbf16>
    tpu.vector_store %arg9[%c0_49, %c0_50], %60 {strides = array<i32>} : memref<128x256xbf16, #tpu.memory_space<vmem>>, vector<8x256xbf16>,
    %c0_51 = arith.constant 0 : index
    %c112_52 = arith.constant 112 : index
    %62 = vector.load %arg8[%c0_51, %c112_52] : memref<8x512xbf16, #tpu.memory_space<vmem>>, vector<8x256xbf16>
    %c8_53 = arith.constant 8 : index
    %c0_54 = arith.constant 0 : index
    %63 = vector.load %arg9[%c8_53, %c0_54] : memref<128x256xbf16, #tpu.memory_space<vmem>>, vector<8x256xbf16>
    tpu.vector_store %arg9[%c8_53, %c0_54], %62 {strides = array<i32>} : memref<128x256xbf16, #tpu.memory_space<vmem>>, vector<8x256xbf16>,
    %c0_55 = arith.constant 0 : index
    %c113_56 = arith.constant 113 : index
    %64 = vector.load %arg8[%c0_55, %c113_56] : memref<8x512xbf16, #tpu.memory_space<vmem>>, vector<8x256xbf16>
    %cst_57 = arith.constant 0.000000e+00 : bf16
    %65 = vector.broadcast %cst_57 : bf16 to vector<8x256xbf16>
    %66 = arith.select %8, %64, %65 : vector<8x256xi1>, vector<8x256xbf16>
    %c16_58 = arith.constant 16 : index
    %c0_59 = arith.constant 0 : index
    %67 = vector.load %arg9[%c16_58, %c0_59] : memref<128x256xbf16, #tpu.memory_space<vmem>>, vector<8x256xbf16>
    tpu.vector_store %arg9[%c16_58, %c0_59], %66 {strides = array<i32>} : memref<128x256xbf16, #tpu.memory_space<vmem>>, vector<8x256xbf16>,
    %c0_60 = arith.constant 0 : index
    %c127_61 = arith.constant 127 : index
    %68 = vector.load %arg8[%c0_60, %c127_61] : memref<8x512xbf16, #tpu.memory_space<vmem>>, vector<8x256xbf16>
    %cst_62 = arith.constant 0.000000e+00 : bf16
    %69 = vector.broadcast %cst_62 : bf16 to vector<8x256xbf16>
    %70 = arith.select %4, %68, %69 : vector<8x256xi1>, vector<8x256xbf16>
    %c24_63 = arith.constant 24 : index
    %c0_64 = arith.constant 0 : index
    %71 = vector.load %arg9[%c24_63, %c0_64] : memref<128x256xbf16, #tpu.memory_space<vmem>>, vector<8x256xbf16>
    tpu.vector_store %arg9[%c24_63, %c0_64], %70 {strides = array<i32>} : memref<128x256xbf16, #tpu.memory_space<vmem>>, vector<8x256xbf16>,
    %c0_65 = arith.constant 0 : index
    %c128_66 = arith.constant 128 : index
    %72 = vector.load %arg8[%c0_65, %c128_66] : memref<8x512xbf16, #tpu.memory_space<vmem>>, vector<8x256xbf16>
    %c32_67 = arith.constant 32 : index
    %c0_68 = arith.constant 0 : index
    %73 = vector.load %arg9[%c32_67, %c0_68] : memref<128x256xbf16, #tpu.memory_space<vmem>>, vector<8x256xbf16>
    tpu.vector_store %arg9[%c32_67, %c0_68], %72 {strides = array<i32>} : memref<128x256xbf16, #tpu.memory_space<vmem>>, vector<8x256xbf16>,
    %c0_69 = arith.constant 0 : index
    %c129_70 = arith.constant 129 : index
    %74 = vector.load %arg8[%c0_69, %c129_70] : memref<8x512xbf16, #tpu.memory_space<vmem>>, vector<8x256xbf16>
    %cst_71 = arith.constant 0.000000e+00 : bf16
    %75 = vector.broadcast %cst_71 : bf16 to vector<8x256xbf16>
    %76 = arith.select %8, %74, %75 : vector<8x256xi1>, vector<8x256xbf16>
    %c40_72 = arith.constant 40 : index
    %c0_73 = arith.constant 0 : index
    %77 = vector.load %arg9[%c40_72, %c0_73] : memref<128x256xbf16, #tpu.memory_space<vmem>>, vector<8x256xbf16>
    tpu.vector_store %arg9[%c40_72, %c0_73], %76 {strides = array<i32>} : memref<128x256xbf16, #tpu.memory_space<vmem>>, vector<8x256xbf16>,
    %c0_74 = arith.constant 0 : index
    %c143_75 = arith.constant 143 : index
    %78 = vector.load %arg8[%c0_74, %c143_75] : memref<8x512xbf16, #tpu.memory_space<vmem>>, vector<8x256xbf16>
    %cst_76 = arith.constant 0.000000e+00 : bf16
    %79 = vector.broadcast %cst_76 : bf16 to vector<8x256xbf16>
    %80 = arith.select %4, %78, %79 : vector<8x256xi1>, vector<8x256xbf16>
    %c48_77 = arith.constant 48 : index
    %c0_78 = arith.constant 0 : index
    %81 = vector.load %arg9[%c48_77, %c0_78] : memref<128x256xbf16, #tpu.memory_space<vmem>>, vector<8x256xbf16>
    tpu.vector_store %arg9[%c48_77, %c0_78], %80 {strides = array<i32>} : memref<128x256xbf16, #tpu.memory_space<vmem>>, vector<8x256xbf16>,
    %c0_79 = arith.constant 0 : index
    %c144_80 = arith.constant 144 : index
    %82 = vector.load %arg8[%c0_79, %c144_80] : memref<8x512xbf16, #tpu.memory_space<vmem>>, vector<8x256xbf16>
    %c56_81 = arith.constant 56 : index
    %c0_82 = arith.constant 0 : index
    %83 = vector.load %arg9[%c56_81, %c0_82] : memref<128x256xbf16, #tpu.memory_space<vmem>>, vector<8x256xbf16>
    tpu.vector_store %arg9[%c56_81, %c0_82], %82 {strides = array<i32>} : memref<128x256xbf16, #tpu.memory_space<vmem>>, vector<8x256xbf16>,
    %c0_83 = arith.constant 0 : index
    %c145_84 = arith.constant 145 : index
    %84 = vector.load %arg8[%c0_83, %c145_84] : memref<8x512xbf16, #tpu.memory_space<vmem>>, vector<8x256xbf16>
    %cst_85 = arith.constant 0.000000e+00 : bf16
    %85 = vector.broadcast %cst_85 : bf16 to vector<8x256xbf16>
    %86 = arith.select %8, %84, %85 : vector<8x256xi1>, vector<8x256xbf16>
    %c64_86 = arith.constant 64 : index
    %c0_87 = arith.constant 0 : index
    %87 = vector.load %arg9[%c64_86, %c0_87] : memref<128x256xbf16, #tpu.memory_space<vmem>>, vector<8x256xbf16>
    tpu.vector_store %arg9[%c64_86, %c0_87], %86 {strides = array<i32>} : memref<128x256xbf16, #tpu.memory_space<vmem>>, vector<8x256xbf16>,
    %c0_88 = arith.constant 0 : index
    %c0_89 = arith.constant 0 : index
    %88 = vector.load %arg5[%c0_88, %c0_89] : memref<8x128xbf16, #tpu.memory_space<vmem>>, vector<8x128xbf16>
    %c0_90 = arith.constant 0 : index
    %c0_91 = arith.constant 0 : index
    %89 = vector.load %arg9[%c0_90, %c0_91] : memref<128x256xbf16, #tpu.memory_space<vmem>>, vector<128x256xbf16>
    %cst_92 = arith.constant dense<0.000000e+00> : vector<8x256xf32>
    %90 = tpu.matmul %88, %89, %cst_92 {dimension_numbers = #tpu.dot_dimension_numbers<[1], [0], [0], [1], [0, 0, 1, 1], [], []>} : vector<8x128xbf16>, vector<128x256xbf16>, vector<8x256xf32> -> vector<8x256xf32>
    %c0_93 = arith.constant 0 : index
    %c0_94 = arith.constant 0 : index
    %91 = vector.load %arg6[%c0_93, %c0_94] : memref<8x1xf32, #tpu.memory_space<vmem>>, vector<8x1xf32>
    %92 = vector.broadcast %91 : vector<8x1xf32> to vector<8x256xf32>
    %93 = arith.addf %90, %92 : vector<8x256xf32>
    %cst_95 = arith.constant 0.000000e+00 : f32
    %94 = vector.broadcast %cst_95 : f32 to vector<8x256xf32>
    %95 = arith.maximumf %93, %94 : vector<8x256xf32>
    %c0_96 = arith.constant 0 : index
    %c0_97 = arith.constant 0 : index
    %c0_98 = arith.constant 0 : index
    %96 = vector.load %arg7[%c0_96, %c0_97, %c0_98] : memref<1x8x256xf32, #tpu.memory_space<vmem>>, vector<1x8x256xf32>
    %97 = vector.shape_cast %96 : vector<1x8x256xf32> to vector<8x256xf32>
    %98 = vector.shape_cast %95 : vector<8x256xf32> to vector<1x8x256xf32>
    tpu.vector_store %arg7[%c0_96, %c0_97, %c0_98], %98 {strides = array<i32>} : memref<1x8x256xf32, #tpu.memory_space<vmem>>, vector<1x8x256xf32>,
    return
  }
  func.func @transform_0(%arg0: i32) -> (i32, i32, i32) {
    %c0_i32 = arith.constant 0 : i32
    %c0_i32_0 = arith.constant 0 : i32
    %c0_i32_1 = arith.constant 0 : i32
    return %arg0, %c0_i32, %c0_i32_0 : i32, i32, i32
  }
  func.func @transform_1(%arg0: i32) -> (i32, i32) {
    %c0_i32 = arith.constant 0 : i32
    %c0_i32_0 = arith.constant 0 : i32
    %c0_i32_1 = arith.constant 0 : i32
    return %c0_i32, %c0_i32_0 : i32, i32
  }
  func.func @transform_2(%arg0: i32) -> (i32, i32) {
    %c0_i32 = arith.constant 0 : i32
    %c0_i32_0 = arith.constant 0 : i32
    %c0_i32_1 = arith.constant 0 : i32
    return %c0_i32, %c0_i32_0 : i32, i32
  }
  func.func @transform_3(%arg0: i32) -> (i32, i32) {
    %c0_i32 = arith.constant 0 : i32
    %c0_i32_0 = arith.constant 0 : i32
    %c0_i32_1 = arith.constant 0 : i32
    return %c0_i32, %c0_i32_0 : i32, i32
  }
  func.func @transform_4(%arg0: i32) -> (i32, i32) {
    %c0_i32 = arith.constant 0 : i32
    %c0_i32_0 = arith.constant 0 : i32
    %c0_i32_1 = arith.constant 0 : i32
    return %c0_i32, %c0_i32_0 : i32, i32
  }
  func.func @transform_5(%arg0: i32) -> (i32, i32) {
    %c0_i32 = arith.constant 0 : i32
    %c0_i32_0 = arith.constant 0 : i32
    %c0_i32_1 = arith.constant 0 : i32
    return %c0_i32, %c0_i32_0 : i32, i32
  }
  func.func @transform_6(%arg0: i32) -> (i32, i32, i32) {
    %c0_i32 = arith.constant 0 : i32
    %c0_i32_0 = arith.constant 0 : i32
    %c0_i32_1 = arith.constant 0 : i32
    return %arg0, %c0_i32, %c0_i32_0 : i32, i32, i32
  }
}

</mosaic_0001>

<bundles_post_ra>
// kernel: double_conv_forward.1
= control target key start
LH: loop header
LB: loop body
LE: loop exit
PB: predicated region body
PF: predicated region fallthrough
CT: control target
= control target key end

     0   :  { %s1094_s21 = smov 0   ;;  %s1373_s0 = inlined_call_operand.vmem [shape: f32[2,8,256], index: 0, kind: input, shape index: {}]   ;;  %s1374_s1 = inlined_call_operand.vmem [shape: s32[1,256], index: 1, kind: input, shape index: {}]   ;;  %s1375_s2 = inlined_call_operand.vmem [shape: bf16[8,128], index: 2, kind: input, shape index: {}]   ;;  %s1376_s3 = inlined_call_operand.vmem [shape: f32[8,1], index: 3, kind: input, shape index: {}]   ;;  %s1377_s4 = inlined_call_operand.vmem [shape: bf16[8,128], index: 4, kind: input, shape index: {}]   ;;  %s1378_s5 = inlined_call_operand.vmem [shape: f32[8,1], index: 5, kind: input, shape index: {}]   ;;  %s1379_s6 = inlined_call_operand.vmem [shape: f32[2,8,256], index: 6, kind: output, shape index: {}]  }
   0x1 LB: > { %s943_s22 = sadd.s32 4294967295, %s1048_s21   ;;  %p947_p0 = scmp.ge.s32.totalorder %s1048_s21, 1  ;;  %s1048_s21 = sphi %s1094_s21, %s16_s21  }
   0x2   : > { %p212_p1 = scmp.lt.s32.totalorder %s1048_s21, 3 }
   0x4   : > { %p213_p2 = pnand %p947_p0, %p212_p1 }
   0x5   : > { %v255_v0 = vld [vmem:[%s1374_s1] sm:$0x3] (!%p213_p2)  ;;  %v258_v1 = vlaneseq (!%p213_p2)  ;;  %v1050_v2 = vmov (!%p213_p2), 0   ;;  %p242_p3 = scmp.lt.s32.totalorder (!%p213_p2), %s943_s22, 1  ;;  %s1051_s29 = smov (!%p213_p2), 111   ;;  %vm308_vm9 = vcmask (!%p213_p2), 908288  }
   0x6   : > { %216 = sbr.rel (%p213_p2) target bundleno = 949 (0x3b5), region = 44  ;;  %vm256_vm0 = vcmp.gt.s32.totalorder (!%p213_p2), %v255_v0, 0  ;;  %280 = vst [vmem:[#allocation2] sm:$0xf] (!%p213_p2), %v1050_v2  ;;  %281 = vst [vmem:[#allocation2 + $0xc] sm:$0xf] (!%p213_p2), %v1050_v2  ;;  %1029 = vset.pattern.permute.xlu0 (!%p213_p2), %v1050_v2  ;;  %602 = vmatprep.mubr.bf16.mxu0 (!%p213_p2), %v1050_v2 }
   0x7   : > { %282 = vst [vmem:[#allocation3 + $0x40] sm:$0xf0] (!%p213_p2), %v1050_v2  ;;  %283 = vst [vmem:[#allocation3 + $0x48] sm:$0xf0] (!%p213_p2), %v1050_v2  ;;  %vm268_vm1 = vcmp.lt.s32.totalorder (!%p213_p2), %v255_v0, 15  ;;  %v259_v3 = vshrl.u32 (!%p213_p2), %v258_v1, 7  ;;  %875 = vmatprep.mubr.bf16.mxu1 (!%p213_p2), %v1050_v2 }
   0x8   : > { %v257_v4 = vsel (!%p213_p2), %vm256_vm0, 1, %v1050_v2  ;;  %v269_v5 = vsel (!%p213_p2), %vm268_vm1, 1, %v1050_v2  ;;  %s1052_s30 = smov (!%p213_p2), 127   ;;  %s1053_s7 = smov (!%p213_p2), 113   ;;  %vm397_vm12 = vcmask (!%p213_p2), 1039360   ;;  %vm365_vm0 = vcmask (!%p213_p2), 924672  }
   0x9   : > { %v260_v6 = vsub.s32 (!%p213_p2), 0, %v259_v3  ;;  %v264_v7 = vsub.s32 (!%p213_p2), 1, %v259_v3  ;;  %s1054_s8 = smov (!%p213_p2), 1   ;;  %s1055_s9 = smov (!%p213_p2), 15  }
   0xa   : > { %s1056_s10 = smov (!%p213_p2), 17   ;;  %s1057_s11 = smov (!%p213_p2), 16  }
   0xb   : > { %v261_v8 = vrot.slane (!%p213_p2), %v257_v4, %v260_v6  ;;  %v265_v9 = vrot.slane (!%p213_p2), %v257_v4, %v264_v7  ;;  %v273_v10 = vrot.slane (!%p213_p2), %v269_v5, %v260_v6  ;;  %v277_v11 = vrot.slane (!%p213_p2), %v269_v5, %v264_v7  ;;  %s1058_s12 = smov (!%p213_p2), 112  }
   0xd   : > { %s1402_s22 = smov (!%p242_p3, %s943_s22), 1  ;;  %vm266_vm2 = vcmp.eq.s32.totalorder %v261_v8, 1  ;;  %vm267_vm3 = vcmp.eq.s32.totalorder %v265_v9, 1  ;;  %vm278_vm4 = vcmp.eq.s32.totalorder %v273_v10, 1  ;;  %vm279_vm5 = vcmp.eq.s32.totalorder %v277_v11, 1 }
   0xe   : > { %s1008_s25 = sshll.u32 %s1402_s22, 4  ;;  %vm303_vm6 = vmpackc.low %vm267_vm3, %vm266_vm2  ;;  %v1033_v22 = vld [vmem:[#allocation2 + $0xc] ss:$0 sps:$4 sm:$0xff]   ;;  %vm385_vm2 = vcmask 121856   ;;  %vm1380_vm3 = vcmask 130048  }
   0xf   : > { %s246_s28 = scalar_lea.vmem %s1373_s0, %s1008_s25  ;;  %v304_v14 = vsel %vm303_vm6, 65537, %v1050_v2  ;;  %vm360_vm7 = vmpackc.low %vm279_vm5, %vm278_vm4  ;;  %v465_v48 = vld [vmem:[#allocation2 + $0xc] sm:$0xf]  ;;  %vm510_vm4 = vcmask 916480   ;;  %s251_s26 = scalar_lea.vmem %s1379_s6, %s1008_s25 }
  0x10   : > { %v290_v12 = vld [vmem:[%s246_s28] sm:$0xff]  ;;  %v291_v13 = vld [vmem:[%s246_s28 + $0x8] sm:$0xff]  ;;  %305 = vrot.lane.b32.xlu0 %v304_v14, %s1051_s29  ;;  %394 = vrot.lane.b32.xlu1 %v304_v14, %s1052_s30  ;;  %v361_v16 = vsel %vm360_vm7, 65537, %v1050_v2  ;;  %vm328_vm7 = vcmask 138240  }
  0x11   : > { %v1123_v15 = vpack.c.bf16 %v291_v13, %v290_v12  ;;  %v1038_v17 = vpack.c.bf16 %v291_v13, %v291_v13  ;;  %v1144_v23 = vpack.c.bf16 %v290_v12, %v290_v12  ;;  %v435_v49 = vld [vmem:[#allocation2 + $0xc] sm:$0xf] }
  0x13   : > { %300 = vst [vmem:[#allocation2 + $0x4] sm:$0xff] %v1123_v15  ;;  %433 = vst [vmem:[#allocation3 + $0x28] sm:$0xf] %v1038_v17 }
  0x14   : > { %362 = vrot.lane.b32.xlu0 %v361_v16, %s1053_s7  ;;  %436 = vrot.lane.b32.xlu1 %v361_v16, %s1054_s8  ;;  %432 = vst [vmem:[#allocation3 + $0x20] sm:$0xf] %v1144_v23 }
  0x18   : > { %466 = vrot.lane.b32.xlu0 %v304_v14, %s1055_s9  ;;  %519 = vrot.lane.b32.xlu1 %v361_v16, %s1056_s10 }
  0x1a   : > { %v1030_v18 = vld [vmem:[#allocation2 + $0x8] ss:$0 sps:$4 sm:$0xff]   ;;  %v1133_v19 = vld [vmem:[#allocation2] sm:$0xff] }
  0x1b   : > { %v957_v20 = vcombine.high %v1133_v19, %v1133_v19  ;;  %v956_v21 = vcombine.low %v1133_v19, %v1133_v19  ;;  %v302_v27 = vld [vmem:[#allocation2 + $0x8] sm:$0xf] }
  0x1c   : > { %349 = vrot.lane.b32.xlu1 %v1030_v18, %s1057_s11  ;;  %v359_v36 = vld [vmem:[#allocation2 + $0x8] sm:$0xf] }
  0x1d   : > { %347 = vrot.lane.b32.xlu0 %v957_v20, %s1057_s11  ;;  %v393_v37 = vld [vmem:[#allocation2 + $0x8] sm:$0xf] }
  0x20   : > { %345 = vrot.lane.b32.xlu1 %v956_v21, %s1057_s11 }
  0x21   : > { %508 = vrot.lane.b32.xlu0 %v1033_v22, %s1058_s12 }
  0x24   : > { %506 = vrot.lane.b32.xlu1 %v1038_v17, %s1058_s12 }
  0x82   : > { %v306_v24 = vpop.permute.xlu0 %305  ;;  %v395_v25 = vpop.permute.xlu1 %394 }
  0x83   : > { %v307_v26 = vrot.slane %v306_v24, 4  ;;  %v396_v28 = vrot.slane %v395_v25, 4 }
  0x85   : > { %vm1147_vm8 = vcmp.ne.s16.totalorder %v307_v26, 0  ;;  %vm1155_vm10 = vcmp.ne.s16.totalorder %v396_v28, 0  ;;  %v1166_v40 = vsel %vm308_vm9, %v307_v26, %v306_v24  ;;  %v1181_v50 = vsel %vm397_vm12, %v396_v28, %v395_v25  ;;  %v727_v25 = vld [vmem:[#allocation2 + $0xc] sm:$0xf] }
  0x86   : > { %v363_v30 = vpop.permute.xlu0 %362  ;;  %v313_v31 = vsel %vm1147_vm8, %v302_v27, 0  ;;  %v1153_v32 = vpop.permute.xlu1 %436  ;;  %v402_v43 = vsel %vm1155_vm10, %v393_v37, 0  ;;  %vm310_vm14 = vcmp.ne.s16.totalorder %v1166_v40, 0  ;;  %vm1381_vm1 = vcmp.ne.s16.totalorder %v1181_v50, 0 }
  0x87   : > { %v364_v33 = vrot.slane %v363_v30, 4  ;;  %v955_v34 = vcombine.low %v313_v31, %v313_v31  ;;  %v438_v38 = vrot.slane %v1153_v32, 4  ;;  %v964_v52 = vcombine.low %v402_v43, %v402_v43 }
  0x88   : > { %v312_v58 = vsel %vm310_vm14, %v1133_v19, 0  ;;  %v401_v61 = vsel %vm1381_vm1, %v1133_v19, 0 }
  0x89   : > { %vm1160_vm11 = vcmp.ne.s16.totalorder %v364_v33, 0  ;;  %326 = vrot.lane.b32.xlu1 %v955_v34, %s1056_s10  ;;  %vm1176_vm13 = vcmp.ne.s16.totalorder %v438_v38, 0  ;;  %v1200_v60 = vsel %vm365_vm0, %v364_v33, %v363_v30  ;;  %v954_v1 = vcombine.high %v312_v58, %v312_v58  ;;  %v751_v34 = vld [vmem:[#allocation2 + $0xc] sm:$0xf] }
  0x8a   : > { %v467_v41 = vpop.permute.xlu0 %466  ;;  %v370_v42 = vsel %vm1160_vm11, %v359_v36, 0  ;;  %v1172_v44 = vpop.permute.xlu1 %519  ;;  %v443_v54 = vsel %vm1176_vm13, %v435_v49, 0  ;;  %vm367_vm5 = vcmp.ne.s16.totalorder %v1200_v60, 0  ;;  %v962_v6 = vcombine.low %v401_v61, %v401_v61  ;;  %v564_v36 = vld [vmem:[%s1376_s3] sm:$0xff] }
  0x8b   : > { %v468_v45 = vrot.slane %v467_v41, 4  ;;  %v961_v46 = vcombine.low %v370_v42, %v370_v42  ;;  %v969_v59 = vcombine.low %v443_v54, %v443_v54  ;;  %v521_v4 = vrot.slane %v1172_v44, 4 }
  0x8c   : > { %v953_v8 = vcombine.low %v312_v58, %v312_v58  ;;  %v369_v10 = vsel %vm367_vm5, %v1133_v19, 0  ;;  %v963_v19 = vcombine.high %v401_v61, %v401_v61  ;;  %v729_v27 = vsel %vm1176_vm13, %v727_v25, 0 }
  0x8d   : > { %vm1184_vm15 = vcmp.ne.s16.totalorder %v468_v45, 0  ;;  %383 = vrot.lane.b32.xlu1 %v961_v46, %s1055_s9  ;;  %v1206_v62 = vsel %vm385_vm2, %v468_v45, %v467_v41  ;;  %v1227_v12 = vsel %vm328_vm7, %v521_v4, %v1172_v44  ;;  %v960_v14 = vcombine.high %v369_v10, %v369_v10 }
  0x8e   : > { %v473_v53 = vsel %vm1184_vm15, %v465_v48, 0  ;;  %v350_v55 = vpop.permute.xlu1 %349  ;;  %vm1382_vm6 = vcmp.ne.s16.totalorder %v1206_v62, 0  ;;  %vm1383_vm1 = vcmp.ne.s16.totalorder %v1227_v12, 0  ;;  %v959_v21 = vcombine.low %v369_v10, %v369_v10 }
  0x8f   : > { %v348_v56 = vpop.permute.xlu0 %347  ;;  %v972_v57 = vcombine.low %v473_v53, %v473_v53  ;;  %v472_v11 = vsel %vm1382_vm6, %v1123_v15, 0  ;;  %v525_v17 = vsel %vm1383_vm1, %v1123_v15, 0  ;;  %v996_v28 = vcombine.low %v729_v27, %v729_v27  ;;  %v1034_v27 = vld [vmem:[#allocation2 + $0xc] ss:$0 sps:$4 sm:$0xff]  }
  0x90   : > { %v353_v0 = vsel %vm1380_vm3, %v348_v56, %v350_v55  ;;  %v971_v13 = vcombine.high %v472_v11, %v472_v11  ;;  %v970_v18 = vcombine.low %v472_v11, %v472_v11  ;;  %v977_v20 = vcombine.high %v525_v17, %v525_v17 }
  0x91   : > { %486 = vrot.lane.b32.xlu0 %v972_v57, %s1053_s7  ;;  %415 = vrot.lane.b32.xlu1 %v964_v52, %s1054_s8  ;;  %357 = vst [vmem:[#allocation3 + $0x8] sm:$0xf0] %v353_v0  ;;  %v976_v24 = vcombine.low %v525_v17, %v525_v17  ;;  %vm1255_vm1 = vcmp.ne.s16.totalorder %v521_v4, 0  ;;  %v753_v37 = vsel %vm1184_vm15, %v751_v34, 0  ;;  %vm1396_vm13 = vcmp.ne.s16.totalorder %v1181_v50, 0 }
  0x92   : > { %v346_v63 = vpop.permute.xlu1 %345 }
  0x93   : > { %v352_v3 = vsel %vm1380_vm3, %v346_v63, %v348_v56  ;;  %v509_v5 = vpop.permute.xlu0 %508  ;;  %vm417_vm3 = vcmask 7168  }
  0x94   : > { %356 = vst [vmem:[#allocation3] sm:$0xf0] %v352_v3  ;;  %v1238_v16 = vsel %vm417_vm3, %v438_v38, %v1153_v32  ;;  %v999_v38 = vcombine.low %v753_v37, %v753_v37 }
  0x95   : > { %456 = vrot.lane.b32.xlu1 %v969_v59, %s1052_s30  ;;  %324 = vrot.lane.b32.xlu0 %v954_v1, %s1056_s10  ;;  %vm440_vm6 = vcmp.ne.s16.totalorder %v1238_v16, 0  ;;  %v797_v16 = vld [vmem:[#allocation2 + $0xc] sm:$0xf] }
  0x96   : > { %v1215_v7 = vpop.permute.xlu1 %506  ;;  %v442_v22 = vsel %vm440_vm6, %v1123_v15, 0  ;;  %v518_v15 = vld [vmem:[#allocation2 + $0xc] sm:$0xf]  ;;  %v799_v35 = vsel %vm1255_vm1, %v797_v16, 0 }
  0x97   : > { %v512_v9 = vsel %vm510_vm4, %v1215_v7, %v509_v5  ;;  %v968_v26 = vcombine.high %v442_v22, %v442_v22  ;;  %v967_v30 = vcombine.low %v442_v22, %v442_v22  ;;  %v526_v32 = vsel %vm1255_vm1, %v518_v15, 0 }
  0x98   : > { %516 = vst [vmem:[#allocation3 + $0x38] sm:$0xf0] %v512_v9  ;;  %v978_v33 = vcombine.low %v526_v32, %v526_v32 }
  0x99   : > { %411 = vrot.lane.b32.xlu1 %v962_v6, %s1054_s8  ;;  %322 = vrot.lane.b32.xlu0 %v953_v8, %s1056_s10 }
  0x9d   : > { %484 = vrot.lane.b32.xlu1 %v971_v13, %s1053_s7  ;;  %381 = vrot.lane.b32.xlu0 %v960_v14, %s1055_s9 }
  0xa1   : > { %482 = vrot.lane.b32.xlu1 %v970_v18, %s1053_s7  ;;  %413 = vrot.lane.b32.xlu0 %v963_v19, %s1054_s8 }
  0xa5   : > { %537 = vrot.lane.b32.xlu1 %v977_v20, %s1051_s29  ;;  %379 = vrot.lane.b32.xlu0 %v959_v21, %s1055_s9 }
  0xa9   : > { %535 = vrot.lane.b32.xlu1 %v976_v24, %s1051_s29  ;;  %454 = vrot.lane.b32.xlu0 %v968_v26, %s1052_s30 }
  0xad   : > { %742 = vrot.lane.b32.xlu1 %v996_v28, %s1052_s30  ;;  %452 = vrot.lane.b32.xlu0 %v967_v30, %s1052_s30 }
  0xb1   : > { %504 = vrot.lane.b32.xlu0 %v1144_v23, %s1058_s12 }
  0xb5   : > { %539 = vrot.lane.b32.xlu0 %v978_v33, %s1051_s29 }
  0xb9   : > { %567 = vperm.xlu0 %1029, %v564_v36  }
  0xbd   : > { %766 = vrot.lane.b32.xlu0 %v999_v38, %s1053_s7 }
  0xc1   : > { %788 = vrot.lane.b32.xlu0 %v1034_v27, %s1058_s12 }
  0xfb   : > { %v327_v41 = vpop.permute.xlu1 %326 }
  0xff   : > { %v384_v42 = vpop.permute.xlu1 %383 }
 0x103   : > { %v487_v43 = vpop.permute.xlu0 %486  ;;  %v416_v44 = vpop.permute.xlu1 %415 }
 0x107   : > { %v457_v23 = vpop.permute.xlu1 %456  ;;  %v325_v45 = vpop.permute.xlu0 %324 }
 0x108   : > { %v330_v46 = vsel %vm328_vm7, %v325_v45, %v327_v41 }
 0x109   : > { %334 = vst [vmem:[#allocation3 + $0x8] sm:$0xf] %v330_v46 }
 0x10b   : > { %v412_v47 = vpop.permute.xlu1 %411  ;;  %v323_v48 = vpop.permute.xlu0 %322 }
 0x10c   : > { %v329_v49 = vsel %vm328_vm7, %v323_v48, %v325_v45 }
 0x10d   : > { %333 = vst [vmem:[#allocation3] sm:$0xf] %v329_v49 }
 0x10f   : > { %v485_v51 = vpop.permute.xlu1 %484  ;;  %v382_v52 = vpop.permute.xlu0 %381 }
 0x110   : > { %v489_v53 = vsel %vm365_vm0, %v485_v51, %v487_v43  ;;  %v387_v54 = vsel %vm385_vm2, %v382_v52, %v384_v42  ;;  %v549_v55 = vld [vmem:[#allocation3 + $0x8] sm:$0xff] }
 0x111   : > { %493 = vst [vmem:[#allocation3 + $0x38] sm:$0xf] %v489_v53  ;;  %391 = vst [vmem:[#allocation3 + $0x18] sm:$0xf] %v387_v54  ;;  %570 = vmatprep.subr.bf16.mxu0 %v549_v55 }
 0x113   : > { %v483_v56 = vpop.permute.xlu1 %482  ;;  %v414_v57 = vpop.permute.xlu0 %413 }
 0x114   : > { %v488_v58 = vsel %vm365_vm0, %v483_v56, %v485_v51  ;;  %v418_v59 = vsel %vm417_vm3, %v412_v47, %v414_v57  ;;  %v419_v61 = vsel %vm417_vm3, %v414_v57, %v416_v44  ;;  %v548_v63 = vld [vmem:[#allocation3] sm:$0xff] }
 0x115   : > { %492 = vst [vmem:[#allocation3 + $0x30] sm:$0xf] %v488_v58  ;;  %422 = vst [vmem:[#allocation3 + $0x10] sm:$0xf0] %v418_v59  ;;  %571 = vmatpush1.bf16.msra.mxu0 %v548_v63 }
 0x116   : > { %423 = vst [vmem:[#allocation3 + $0x18] sm:$0xf0] %v419_v61 }
 0x117   : > { %v538_v0 = vpop.permute.xlu1 %537  ;;  %v380_v1 = vpop.permute.xlu0 %379 }
 0x118   : > { %v386_v3 = vsel %vm385_vm2, %v380_v1, %v382_v52  ;;  %v555_v22 = vld [vmem:[#allocation3 + $0x38] sm:$0xff] }
 0x119   : > { %390 = vst [vmem:[#allocation3 + $0x10] sm:$0xf] %v386_v3 }
 0x11b   : > { %v536_v4 = vpop.permute.xlu1 %535  ;;  %v455_v5 = vpop.permute.xlu0 %454 }
 0x11c   : > { %v541_v6 = vsel %vm308_vm9, %v536_v4, %v538_v0  ;;  %v459_v8 = vsel %vm397_vm12, %v455_v5, %v457_v23 }
 0x11d   : > { %v551_v9 = vld [vmem:[#allocation3 + $0x18] sm:$0xff]  ;;  %545 = vst [vmem:[#allocation3 + $0x40] sm:$0xf] %v541_v6  ;;  %463 = vst [vmem:[#allocation3 + $0x28] sm:$0xf0] %v459_v8  ;;  %v837_v8 = vld [vmem:[%s1378_s5] sm:$0xff] }
 0x11e   : > { %572 = vmatprep.subr.bf16.mxu0 %v551_v9 }
 0x11f   : > { %v453_v10 = vpop.permute.xlu0 %452 }
 0x120   : > { %v458_v11 = vsel %vm397_vm12, %v453_v10, %v455_v5  ;;  %v550_v13 = vld [vmem:[#allocation3 + $0x10] sm:$0xff]  ;;  %v1005_v5 = vcombine.low %v799_v35, %v799_v35 }
 0x121   : > { %462 = vst [vmem:[#allocation3 + $0x20] sm:$0xf0] %v458_v11  ;;  %573 = vmatpush1.bf16.msra.mxu0 %v550_v13  ;;  %v743_v13 = vpop.permute.xlu1 %742 }
 0x123   : > { %v505_v14 = vpop.permute.xlu0 %504 }
 0x124   : > { %v511_v17 = vsel %vm510_vm4, %v505_v14, %v1215_v7  ;;  %v553_v18 = vld [vmem:[#allocation3 + $0x28] sm:$0xff]  ;;  %v556_v26 = vld [vmem:[#allocation3 + $0x40] sm:$0xff]  ;;  %v547_v7 = vld [vmem:[%s1375_s2] sm:$0xf] }
 0x125   : > { %515 = vst [vmem:[#allocation3 + $0x30] sm:$0xf0] %v511_v17  ;;  %574 = vmatprep.subr.bf16.mxu0 %v553_v18 }
 0x127   : > { %v540_v19 = vpop.permute.xlu0 %539 }
 0x128   : > { %v542_v20 = vsel %vm308_vm9, %v538_v0, %v540_v19  ;;  %v552_v21 = vld [vmem:[#allocation3 + $0x20] sm:$0xff] }
 0x129   : > { %546 = vst [vmem:[#allocation3 + $0x48] sm:$0xf] %v542_v20  ;;  %575 = vmatpush1.bf16.msra.mxu0 %v552_v21 }
 0x12a   : > { %576 = vmatprep.subr.bf16.mxu0 %v555_v22 }
 0x12c   : > { %v554_v24 = vld [vmem:[#allocation3 + $0x30] sm:$0xff] }
 0x12d   : > { %577 = vmatpush1.bf16.msra.mxu0 %v554_v24 }
 0x130   : > { %v557_v25 = vld [vmem:[#allocation3 + $0x48] sm:$0xff] }
 0x131   : > { %578 = vmatprep.subr.bf16.mxu0 %v557_v25 }
 0x132   : > { %579 = vmatpush1.bf16.msra.mxu0 %v556_v26 }
 0x133   : > { %580 = vmatprep.subr.bf16.mxu0 %v1050_v2 }
 0x136   : > { %581 = vmatpush1.bf16.msra.mxu0 %v1050_v2 }
 0x137   : > { %582 = vmatprep.subr.bf16.mxu0 %v1050_v2 }
 0x138   : > { %v568_v28 = vpop.permute.xlu0 %567 }
 0x13a   : > { %583 = vmatpush1.bf16.msra.mxu0 %v1050_v2 }
 0x13b   : > { %584 = vmatprep.subr.bf16.mxu0 %v1050_v2 }
 0x13c   : > { %v767_v10 = vpop.permute.xlu0 %766 }
 0x13e   : > { %585 = vmatpush1.bf16.msra.mxu0 %v1050_v2 }
 0x140   : > { %v789_v11 = vpop.permute.xlu0 %788 }
 0x141   : > { %603 = vmatmul.mubr.bf16.vlgmr.msra.gmra.mrb[0].mxu0 %v547_v7 }
 0x214   : > { %v604_v30 = vpop.f32.mrb[0].mxu0 }
 0x215   : > { %v605_v15 = vadd.f32 %v604_v30, %v568_v28  ;;  %v606_v32 = vpop.f32.mrb[1].mxu0 }
 0x216   : > { %v607_v33 = vadd.f32 %v606_v32, %v568_v28  ;;  %v608_v34 = vpop.f32.mrb[2].mxu0 }
 0x217   : > { %v611_v36 = vmax.f32 %v605_v15, 0.0  ;;  %v609_v37 = vpop.f32.mrb[3].mxu0 }
 0x218   : > { %v612_v38 = vmax.f32 %v607_v33, 0.0 }
 0x219   : > { %v1041_v43 = vpack.c.bf16 %v611_v36, %v611_v36 }
 0x21a   : > { %v1011_v41 = vpack.c.bf16 %v612_v38, %v611_v36  ;;  %v1040_v42 = vpack.c.bf16 %v612_v38, %v612_v38 }
 0x21b   : > { %724 = vst [vmem:[#allocation3 + $0x20] sm:$0xf] %v1041_v43 }
 0x21c   : > { %621 = vst [vmem:[#allocation2 + $0x4] sm:$0xff] %v1011_v41  ;;  %725 = vst [vmem:[#allocation3 + $0x28] sm:$0xf] %v1040_v42  ;;  %v728_v50 = vsel %vm440_vm6, %v1011_v41, 0 }
 0x21d   : > { %v995_v61 = vcombine.high %v728_v50, %v728_v50  ;;  %v994_v39 = vcombine.low %v728_v50, %v728_v50 }
 0x223   : > { %v1035_v44 = vld [vmem:[#allocation2 + $0x8] ss:$0 sps:$4 sm:$0xff]   ;;  %v646_v23 = vld [vmem:[#allocation2] sm:$0xff] }
 0x224   : > { %v984_v45 = vcombine.high %v646_v23, %v646_v23  ;;  %660 = vrot.lane.b32.xlu1 %v1035_v44, %s1057_s11  ;;  %v624_v46 = vsel %vm310_vm14, %v646_v23, 0  ;;  %v983_v47 = vcombine.low %v646_v23, %v646_v23  ;;  %v670_v49 = vsel %vm367_vm5, %v646_v23, 0  ;;  %v623_v53 = vld [vmem:[#allocation2 + $0x8] sm:$0xf] }
 0x225   : > { %v980_v48 = vcombine.low %v624_v46, %v624_v46  ;;  %v987_v51 = vcombine.high %v670_v49, %v670_v49  ;;  %v694_v52 = vsel %vm1396_vm13, %v646_v23, 0  ;;  %v981_v40 = vcombine.high %v624_v46, %v624_v46  ;;  %v669_v60 = vld [vmem:[#allocation2 + $0x8] sm:$0xf] }
 0x226   : > { %658 = vrot.lane.b32.xlu0 %v984_v45, %s1057_s11  ;;  %v990_v54 = vcombine.high %v694_v52, %v694_v52  ;;  %v625_v55 = vsel %vm1147_vm8, %v623_v53, 0  ;;  %v986_v57 = vcombine.low %v670_v49, %v670_v49  ;;  %v671_v58 = vsel %vm1160_vm11, %v669_v60, 0  ;;  %v693_v59 = vld [vmem:[#allocation2 + $0x8] sm:$0xf] }
 0x227   : > { %v982_v56 = vcombine.low %v625_v55, %v625_v55  ;;  %v988_v29 = vcombine.low %v671_v58, %v671_v58  ;;  %v695_v63 = vsel %vm1155_vm10, %v693_v59, 0  ;;  %v989_v1 = vcombine.low %v694_v52, %v694_v52 }
 0x228   : > { %656 = vrot.lane.b32.xlu1 %v983_v47, %s1057_s11  ;;  %v991_v0 = vcombine.low %v695_v63, %v695_v63  ;;  %vm1397_vm8 = vcmp.ne.s16.totalorder %v1206_v62, 0  ;;  %vm1398_vm10 = vcmp.ne.s16.totalorder %v1227_v12, 0  ;;  %vm1399_vm11 = vcmask 130048  }
 0x229   : > { %v752_v3 = vsel %vm1397_vm8, %v1011_v41, 0  ;;  %v798_v62 = vsel %vm1398_vm10, %v1011_v41, 0  ;;  %vm1400_vm14 = vmmov %vm1399_vm11 }
 0x22a   : > { %634 = vrot.lane.b32.xlu0 %v980_v48, %s1056_s10  ;;  %v998_v4 = vcombine.high %v752_v3, %v752_v3  ;;  %v997_v6 = vcombine.low %v752_v3, %v752_v3  ;;  %v1004_v31 = vcombine.high %v798_v62, %v798_v62  ;;  %v1003_v9 = vcombine.low %v798_v62, %v798_v62 }
 0x22c   : > { %786 = vrot.lane.b32.xlu1 %v1040_v42, %s1058_s12 }
 0x22e   : > { %682 = vrot.lane.b32.xlu0 %v987_v51, %s1055_s9 }
 0x230   : > { %636 = vrot.lane.b32.xlu1 %v981_v40, %s1056_s10 }
 0x232   : > { %706 = vrot.lane.b32.xlu0 %v990_v54, %s1054_s8 }
 0x234   : > { %638 = vrot.lane.b32.xlu1 %v982_v56, %s1056_s10 }
 0x236   : > { %680 = vrot.lane.b32.xlu0 %v986_v57, %s1055_s9 }
 0x238   : > { %684 = vrot.lane.b32.xlu1 %v988_v29, %s1055_s9 }
 0x23a   : > { %740 = vrot.lane.b32.xlu0 %v995_v61, %s1052_s30 }
 0x23c   : > { %708 = vrot.lane.b32.xlu1 %v991_v0, %s1054_s8  ;;  %v820_v0 = vld [vmem:[%s1377_s4] sm:$0xf] }
 0x23e   : > { %738 = vrot.lane.b32.xlu0 %v994_v39, %s1052_s30 }
 0x240   : > { %704 = vrot.lane.b32.xlu1 %v989_v1, %s1054_s8 }
 0x242   : > { %784 = vrot.lane.b32.xlu0 %v1041_v43, %s1058_s12 }
 0x244   : > { %764 = vrot.lane.b32.xlu1 %v998_v4, %s1053_s7 }
 0x246   : > { %812 = vrot.lane.b32.xlu0 %v1005_v5, %s1051_s29 }
 0x248   : > { %762 = vrot.lane.b32.xlu1 %v997_v6, %s1053_s7 }
 0x24a   : > { %840 = vperm.xlu0 %1029, %v837_v8  }
 0x24c   : > { %810 = vrot.lane.b32.xlu1 %v1004_v31, %s1051_s29 }
 0x250   : > { %808 = vrot.lane.b32.xlu1 %v1003_v9, %s1051_s29 }
 0x296   : > { %v661_v14 = vpop.permute.xlu1 %660 }
 0x298   : > { %v659_v17 = vpop.permute.xlu0 %658 }
 0x299   : > { %v663_v18 = vsel %vm1399_vm11, %v659_v17, %v661_v14 }
 0x29a   : > { %667 = vst [vmem:[#allocation3 + $0x8] sm:$0xf0] %v663_v18  ;;  %v657_v19 = vpop.permute.xlu1 %656 }
 0x29b   : > { %v662_v12 = vsel %vm1400_vm14, %v657_v19, %v659_v17 }
 0x29c   : > { %v635_v20 = vpop.permute.xlu0 %634  ;;  %666 = vst [vmem:[#allocation3] sm:$0xf0] %v662_v12 }
 0x29e   : > { %v787_v21 = vpop.permute.xlu1 %786 }
 0x29f   : > { %v791_v22 = vsel %vm510_vm4, %v787_v21, %v789_v11 }
 0x2a0   : > { %v683_v24 = vpop.permute.xlu0 %682  ;;  %795 = vst [vmem:[#allocation3 + $0x38] sm:$0xf0] %v791_v22 }
 0x2a2   : > { %v637_v25 = vpop.permute.xlu1 %636 }
 0x2a3   : > { %v640_v26 = vsel %vm328_vm7, %v635_v20, %v637_v25 }
 0x2a4   : > { %v707_v7 = vpop.permute.xlu0 %706  ;;  %644 = vst [vmem:[#allocation3] sm:$0xf] %v640_v26 }
 0x2a6   : > { %v639_v27 = vpop.permute.xlu1 %638 }
 0x2a7   : > { %v641_v28 = vsel %vm328_vm7, %v637_v25, %v639_v27 }
 0x2a8   : > { %v681_v30 = vpop.permute.xlu0 %680  ;;  %645 = vst [vmem:[#allocation3 + $0x8] sm:$0xf] %v641_v28 }
 0x2a9   : > { %v686_v15 = vsel %vm385_vm2, %v681_v30, %v683_v24 }
 0x2aa   : > { %690 = vst [vmem:[#allocation3 + $0x10] sm:$0xf] %v686_v15  ;;  %v685_v32 = vpop.permute.xlu1 %684 }
 0x2ab   : > { %v687_v33 = vsel %vm385_vm2, %v683_v24, %v685_v32  ;;  %v821_v44 = vld [vmem:[#allocation3] sm:$0xff] }
 0x2ac   : > { %v741_v34 = vpop.permute.xlu0 %740  ;;  %691 = vst [vmem:[#allocation3 + $0x18] sm:$0xf] %v687_v33 }
 0x2ad   : > { %v745_v36 = vsel %vm397_vm12, %v741_v34, %v743_v13 }
 0x2ae   : > { %749 = vst [vmem:[#allocation3 + $0x28] sm:$0xf0] %v745_v36  ;;  %v709_v37 = vpop.permute.xlu1 %708 }
 0x2af   : > { %v711_v38 = vsel %vm417_vm3, %v707_v7, %v709_v37  ;;  %v822_v42 = vld [vmem:[#allocation3 + $0x8] sm:$0xff] }
 0x2b0   : > { %v739_v41 = vpop.permute.xlu0 %738  ;;  %715 = vst [vmem:[#allocation3 + $0x18] sm:$0xf0] %v711_v38  ;;  %843 = vmatprep.subr.bf16.mxu1 %v822_v42 }
 0x2b1   : > { %v744_v43 = vsel %vm397_vm12, %v739_v41, %v741_v34  ;;  %844 = vmatpush1.bf16.msra.mxu1 %v821_v44 }
 0x2b2   : > { %748 = vst [vmem:[#allocation3 + $0x20] sm:$0xf0] %v744_v43  ;;  %v705_v23 = vpop.permute.xlu1 %704 }
 0x2b3   : > { %v710_v45 = vsel %vm417_vm3, %v705_v23, %v707_v7 }
 0x2b4   : > { %v785_v46 = vpop.permute.xlu0 %784  ;;  %714 = vst [vmem:[#allocation3 + $0x10] sm:$0xf0] %v710_v45 }
 0x2b5   : > { %v790_v47 = vsel %vm510_vm4, %v785_v46, %v787_v21  ;;  %v826_v54 = vld [vmem:[#allocation3 + $0x28] sm:$0xff] }
 0x2b6   : > { %794 = vst [vmem:[#allocation3 + $0x30] sm:$0xf0] %v790_v47  ;;  %v765_v48 = vpop.permute.xlu1 %764 }
 0x2b7   : > { %v769_v49 = vsel %vm365_vm0, %v765_v48, %v767_v10  ;;  %v824_v51 = vld [vmem:[#allocation3 + $0x18] sm:$0xff] }
 0x2b8   : > { %773 = vst [vmem:[#allocation3 + $0x38] sm:$0xf] %v769_v49  ;;  %845 = vmatprep.subr.bf16.mxu1 %v824_v51  ;;  %v813_v55 = vpop.permute.xlu0 %812 }
 0x2b9   : > { %v825_v57 = vld [vmem:[#allocation3 + $0x20] sm:$0xff] }
 0x2ba   : > { %v763_v52 = vpop.permute.xlu1 %762 }
 0x2bb   : > { %v768_v53 = vsel %vm365_vm0, %v763_v52, %v765_v48  ;;  %v823_v40 = vld [vmem:[#allocation3 + $0x10] sm:$0xff] }
 0x2bc   : > { %772 = vst [vmem:[#allocation3 + $0x30] sm:$0xf] %v768_v53  ;;  %846 = vmatpush1.bf16.msra.mxu1 %v823_v40 }
 0x2bd   : > { %847 = vmatprep.subr.bf16.mxu1 %v826_v54 }
 0x2be   : > { %v811_v60 = vpop.permute.xlu1 %810 }
 0x2bf   : > { %v815_v56 = vsel %vm308_vm9, %v811_v60, %v813_v55  ;;  %v828_v58 = vld [vmem:[#allocation3 + $0x38] sm:$0xff] }
 0x2c0   : > { %819 = vst [vmem:[#allocation3 + $0x48] sm:$0xf] %v815_v56  ;;  %848 = vmatpush1.bf16.msra.mxu1 %v825_v57 }
 0x2c1   : > { %849 = vmatprep.subr.bf16.mxu1 %v828_v58 }
 0x2c2   : > { %v809_v50 = vpop.permute.xlu1 %808 }
 0x2c3   : > { %v814_v59 = vsel %vm308_vm9, %v809_v50, %v811_v60  ;;  %v827_v29 = vld [vmem:[#allocation3 + $0x30] sm:$0xff] }
 0x2c4   : > { %818 = vst [vmem:[#allocation3 + $0x40] sm:$0xf] %v814_v59  ;;  %850 = vmatpush1.bf16.msra.mxu1 %v827_v29 }
 0x2c7   : > { %v830_v61 = vld [vmem:[#allocation3 + $0x48] sm:$0xff] }
 0x2c8   : > { %851 = vmatprep.subr.bf16.mxu1 %v830_v61 }
 0x2c9   : > { %v841_v39 = vpop.permute.xlu0 %840 }
 0x2cb   : > { %v829_v63 = vld [vmem:[#allocation3 + $0x40] sm:$0xff] }
 0x2cc   : > { %852 = vmatpush1.bf16.msra.mxu1 %v829_v63 }
 0x2cd   : > { %853 = vmatprep.subr.bf16.mxu1 %v1050_v2 }
 0x2d0   : > { %854 = vmatpush1.bf16.msra.mxu1 %v1050_v2 }
 0x2d1   : > { %855 = vmatprep.subr.bf16.mxu1 %v1050_v2 }
 0x2d4   : > { %856 = vmatpush1.bf16.msra.mxu1 %v1050_v2 }
 0x2d5   : > { %857 = vmatprep.subr.bf16.mxu1 %v1050_v2 }
 0x2d8   : > { %858 = vmatpush1.bf16.msra.mxu1 %v1050_v2 }
 0x2db   : > { %876 = vmatmul.mubr.bf16.vlgmr.msra.gmra.mrb[0].mxu1 %v820_v0 }
 0x3ae   : > { %v877_v16 = vpop.f32.mrb[0].mxu1 }
 0x3af   : > { %v878_v1 = vadd.f32 %v877_v16, %v841_v39  ;;  %v879_v3 = vpop.f32.mrb[1].mxu1 }
 0x3b0   : > { %v880_v35 = vadd.f32 %v879_v3, %v841_v39  ;;  %v881_v4 = vpop.f32.mrb[2].mxu1 }
 0x3b1   : > { %v884_v5 = vmax.f32 %v878_v1, 0.0  ;;  %v882_v6 = vpop.f32.mrb[3].mxu1 }
 0x3b2   : > { %v885_v8 = vmax.f32 %v880_v35, 0.0 }
 0x3b3   : > { %886 = vst [vmem:[%s251_s26] sm:$0xff] %v884_v5 }
 0x3b4   : > { %887 = vst [vmem:[%s251_s26 + $0x8] sm:$0xff] %v885_v8 }
 0x3b5 PF: > { %s16_s21 = sadd.s32 1, %s1048_s21  }
 0x3b6   : > { %p13_p4 = scmp.ge.s32.totalorder %s16_s21, 4  }
 0x3b8   :  { %15 = sbr.rel (!%p13_p4) target bundleno = 1 (0x1), region = 74 }

</bundles_post_ra>
